<compile_context>
chip_gen: v6e
topology: v6e:2x2x1
jax: 0.10.0
libtpu: 0.0.40
codegen_flags: <defaults>
</compile_context>

<pallas_src>
import functools

import jax
import jax.numpy as jnp
from jax.experimental import pallas as pl
from jax.experimental.pallas import tpu as pltpu


# ----------------------------------------------------------------------------
# Hardware-aware sizing helpers.
# ----------------------------------------------------------------------------
def _cdiv(a, b):
    return -(-a // b)


def _vmem_limit_bytes():
    """Scoped-VMEM limit to request, sized per TPU generation."""
    cap = 64 * 1024 * 1024  # conservative fallback (v7x physical VMEM)
    try:
        info = pltpu.get_tpu_info()
        cap = int(getattr(info, "vmem_capacity_bytes", cap)) or cap
    except Exception:
        pass
    # ~60% of physical, capped at 96 MiB (=> ~77 MiB on v5e/v6e, ~38 MiB on v7x).
    return min(int(cap * 0.6), 96 * 1024 * 1024)


def _min_sublane(dtype):
    """Minimum efficient sublane tile for a dtype (f32:8 bf16:16 i8:32)."""
    itemsize = jnp.dtype(dtype).itemsize
    return 8 * max(1, 4 // max(1, itemsize))


def _choose_tile_n(n, dim, in_dtype, out_dtype, vmem_limit, *,
                   tile_n=None, include_out=True):
    """Pick a large row tile that fits the VMEM budget.

    Budget per row: double-buffered input tile (real itemsize), the (pass-2
    only) double-buffered output tile, and ~2 f32 temporaries.
    """
    sub = _min_sublane(in_dtype)
    n_cap = max(sub, ((n + sub - 1) // sub) * sub)
    if tile_n is not None:
        t = max(sub, (int(tile_n) // sub) * sub)
        return min(t, n_cap)

    in_item = jnp.dtype(in_dtype).itemsize
    out_item = jnp.dtype(out_dtype).itemsize
    per_row = 2 * in_item * dim + 8 * dim
    if include_out:
        per_row += 2 * out_item * dim

    t = int(vmem_limit * 0.7) // max(per_row, 1)
    t = max(sub, min(t, 8192, n_cap))
    t = (t // sub) * sub

    # Prefer a tile that divides N exactly, but NEVER at the cost of
    # collapsing the tile -- tail masking handles the remainder.
    floor_t = max(512, t // 2)
    cand = t
    while cand >= floor_t:
        if n % cand == 0:
            return cand
        cand -= sub
    return t


def _x_spec(t, dim, index_map, dtype, num_steps):
    """Streamed-x BlockSpec; triple-buffer short DMAs (mainly a v7x win)."""
    tile_bytes = t * dim * jnp.dtype(dtype).itemsize
    if tile_bytes < (4 << 20) and num_steps >= 4:
        return pl.BlockSpec((t, dim), index_map, pipeline_mode=pl.Buffered(3))
    return pl.BlockSpec((t, dim), index_map)


# ----------------------------------------------------------------------------
# Kernel A (small inputs): fully fused BatchNorm1d, whole array resident.
#   x stays lane-dense (N, dim); the group fold runs on tiny (1, dim) vectors.
# ----------------------------------------------------------------------------
def _fused_kernel(x_ref, gamma_ref, beta_ref, o_ref, *, eps, groups, count):
    x = x_ref[...].astype(jnp.float32)                  # (N, dim)
    dim = x.shape[1]
    d = dim // groups
    s = jnp.sum(x, axis=0, keepdims=True)               # (1, dim)
    q = jnp.sum(x * x, axis=0, keepdims=True)           # (1, dim)
    if groups > 1:                                      # fold columns -> channels
        s_ch = s[:, 0:d]
        q_ch = q[:, 0:d]
        for gi in range(1, groups):
            s_ch = s_ch + s[:, gi * d:(gi + 1) * d]
            q_ch = q_ch + q[:, gi * d:(gi + 1) * d]
    else:
        s_ch, q_ch = s, q
    inv_c = 1.0 / count
    mean = s_ch * inv_c
    var = jnp.maximum(q_ch * inv_c - mean * mean, 0.0)  # biased, clamped
    inv_std = jax.lax.rsqrt(var + eps)
    scale = gamma_ref[...].astype(jnp.float32) * inv_std     # (1, d)
    shift = beta_ref[...].astype(jnp.float32) - mean * scale
    if groups > 1:                                      # tile back to lane-dense
        scale = jnp.concatenate([scale] * groups, axis=-1)
        shift = jnp.concatenate([shift] * groups, axis=-1)
    o_ref[...] = (x * scale + shift).astype(o_ref.dtype)


# ----------------------------------------------------------------------------
# Kernel B1 (streaming): per-column partial sums, deferred sublane reduce.
#   grid = (chunks, steps); chunk axis is "parallel" (splits across TCs on
#   v7x), step axis is the "arbitrary" reduction axis.  Each chunk owns its
#   own (8, dim) partial-sum output block (accumulated with pure VPU adds).
#   The tail tile (and any duplicated step from an odd tile count) is masked
#   with an in-kernel row mask, so ragged N needs no HBM padding copy.
# ----------------------------------------------------------------------------
def _sums_kernel(x_ref, sum_ref, sq_ref, *, tile_n, steps_per_chunk, n_rows):
    i = pl.program_id(1)

    @pl.when(i == 0)
    def _():
        sum_ref[...] = jnp.zeros_like(sum_ref)
        sq_ref[...] = jnp.zeros_like(sq_ref)

    step = pl.program_id(0) * steps_per_chunk + i
    row_start = step * tile_n

    x = x_ref[...].astype(jnp.float32)                  # (tile_n, dim)
    rows, dim = x.shape
    row_ids = jax.lax.broadcasted_iota(jnp.int32, (rows, dim), 0)
    xm = jnp.where(row_ids < (n_rows - row_start), x, 0.0)

    x3 = xm.reshape(rows // 8, 8, dim)                  # leading-axis split: no relayout
    sum_ref[...] += jnp.sum(x3, axis=0)                 # (8, dim) VPU adds
    sq_ref[...] += jnp.sum(x3 * x3, axis=0)


# ----------------------------------------------------------------------------
# Kernel B2 (streaming): elementwise normalize  y = x * scale + shift.
#   Out-of-bounds rows of the last block are clipped by Pallas on store.
# ----------------------------------------------------------------------------
def _norm_kernel(x_ref, scale_ref, shift_ref, o_ref):
    x = x_ref[...].astype(jnp.float32)
    o_ref[...] = (x * scale_ref[...] + shift_ref[...]).astype(o_ref.dtype)


# ----------------------------------------------------------------------------
# Streaming (tiled) path: lane-dense layout, group / lane-fold done in glue.
# ----------------------------------------------------------------------------
def _batchnorm_tiled(x2d, gamma, beta, g, eps, tile_n, vmem_limit):
    orig_n, orig_dim = x2d.shape
    d = orig_dim // g

    # Lane-densify small feature dims: fold f rows into the lane axis so
    # vregs/stores use all 128 lanes (free reshape of contiguous memory).
    f = 1
    if orig_dim < 128 and (128 % orig_dim == 0):
        fc = 128 // orig_dim
        if orig_n % fc == 0:
            f = fc
            x2d = x2d.reshape(orig_n // fc, fc * orig_dim)
    n, dim = x2d.shape

    # ---- pass 1: per-column partial sums -------------------------------------
    t1 = _choose_tile_n(n, dim, x2d.dtype, x2d.dtype, vmem_limit,
                        tile_n=tile_n, include_out=False)
    n_tiles1 = _cdiv(n, t1)
    chunks = 2 if n_tiles1 >= 2 else 1          # keep both v7x TCs busy
    k = _cdiv(n_tiles1, chunks)

    sum_p, sq_p = pl.pallas_call(
        functools.partial(_sums_kernel, tile_n=t1, steps_per_chunk=k, n_rows=n),
        out_shape=(jax.ShapeDtypeStruct((chunks * 8, dim), jnp.float32),
                   jax.ShapeDtypeStruct((chunks * 8, dim), jnp.float32)),
        grid_spec=pltpu.PrefetchScalarGridSpec(
            num_scalar_prefetch=0,
            grid=(chunks, k),
            in_specs=[_x_spec(
                t1, dim,
                lambda c, i: (jnp.minimum(c * k + i, n_tiles1 - 1), 0),
                x2d.dtype, chunks * k)],
            out_specs=(pl.BlockSpec((8, dim), lambda c, i: (c, 0)),
                       pl.BlockSpec((8, dim), lambda c, i: (c, 0)))),
        compiler_params=pltpu.CompilerParams(
            dimension_semantics=("parallel", "arbitrary"),
            vmem_limit_bytes=vmem_limit),
    )(x2d)

    # ---- tiny glue: fold chunks/sublanes/lane-folds/groups -> scale & shift --
    count = orig_n * g                                  # rows of the (N*G, d) view
    tot_s = jnp.sum(sum_p, axis=0)                      # (dim,)
    tot_q = jnp.sum(sq_p, axis=0)
    if f > 1:
        tot_s = tot_s.reshape(f, orig_dim).sum(axis=0)  # (orig_dim,)
        tot_q = tot_q.reshape(f, orig_dim).sum(axis=0)
    if g > 1:
        tot_s = tot_s.reshape(g, d).sum(axis=0)         # (d,)
        tot_q = tot_q.reshape(g, d).sum(axis=0)
    mean = tot_s / count
    var = jnp.maximum(tot_q / count - mean * mean, 0.0)
    inv_std = jax.lax.rsqrt(var + eps)
    scale = gamma.astype(jnp.float32) * inv_std         # (d,)
    shift = beta.astype(jnp.float32) - mean * scale
    if g > 1:                                           # back to lane-dense layout
        scale = jnp.tile(scale, g)
        shift = jnp.tile(shift, g)
    if f > 1:
        scale = jnp.tile(scale, f)
        shift = jnp.tile(shift, f)
    scale = scale.reshape(1, dim)
    shift = shift.reshape(1, dim)

    # ---- pass 2: normalize ----------------------------------------------------
    t2 = _choose_tile_n(n, dim, x2d.dtype, x2d.dtype, vmem_limit,
                        tile_n=tile_n, include_out=True)
    n_tiles2 = _cdiv(n, t2)

    y = pl.pallas_call(
        _norm_kernel,
        out_shape=jax.ShapeDtypeStruct((n, dim), x2d.dtype),
        grid_spec=pltpu.PrefetchScalarGridSpec(
            num_scalar_prefetch=0,
            grid=(n_tiles2,),
            in_specs=[_x_spec(t2, dim, lambda i: (i, 0), x2d.dtype, n_tiles2),
                      pl.BlockSpec((1, dim), lambda i: (0, 0)),
                      pl.BlockSpec((1, dim), lambda i: (0, 0))],
            out_specs=pl.BlockSpec((t2, dim), lambda i: (i, 0))),
        compiler_params=pltpu.CompilerParams(
            dimension_semantics=("parallel",),
            vmem_limit_bytes=vmem_limit),
    )(x2d, scale, shift)

    if f > 1:
        y = y.reshape(orig_n, orig_dim)
    return y


# ----------------------------------------------------------------------------
# Public forward.
# ----------------------------------------------------------------------------
def time_first_batchnorm1d(x, gamma, beta, *, groups=None, eps=1e-5,
                           tile_n=None, force_tiled=False):
    """Forward of TimeFirstBatchNorm1d.

    x: (batch, length, dim); gamma, beta: (dim // groups,) if groups else (dim,).
    Returns (batch, length, groups, dim//groups) if groups else (batch, length, dim).
    """
    b, length, dim = x.shape
    g = groups if groups else 1
    assert dim % g == 0, "dim must be divisible by groups"
    d = dim // g
    assert gamma.shape == (d,) and beta.shape == (d,)

    vmem_limit = _vmem_limit_bytes()
    n_rows = b * length
    in_item = jnp.dtype(x.dtype).itemsize

    # Small inputs: single fused kernel, lane-dense (N, dim), x read once.
    # VMEM estimate: in + out at real itemsize + ~2 f32 temporaries per element.
    fused_bytes = n_rows * dim * (2 * in_item + 8)
    x2d = x.reshape(n_rows, dim)

    if (not force_tiled) and fused_bytes <= vmem_limit:
        y2d = pl.pallas_call(
            functools.partial(_fused_kernel, eps=eps, groups=g,
                              count=n_rows * g),
            out_shape=jax.ShapeDtypeStruct((n_rows, dim), x.dtype),
            compiler_params=pltpu.CompilerParams(vmem_limit_bytes=vmem_limit),
        )(x2d, gamma.reshape(1, d), beta.reshape(1, d))
    else:
        # Large inputs: streaming two-pass path, lane-dense layout.
        y2d = _batchnorm_tiled(x2d, gamma, beta, g, eps, tile_n, vmem_limit)

    if groups:
        return y2d.reshape(-1, length, groups, d)
    return y2d.reshape(-1, length, d)


# ----------------------------------------------------------------------------
# Pure-JAX reference (mirrors PyTorch training-mode BatchNorm1d forward).
# ----------------------------------------------------------------------------
def _reference(x, gamma, beta, *, groups=None, eps=1e-5):
    b, length, dim = x.shape
    d = dim // groups if groups else dim
    t = x.reshape(-1, d).astype(jnp.float32)
    mean = t.mean(axis=0, keepdims=True)
    var = t.var(axis=0, keepdims=True)  # biased
    y = (t - mean) / jnp.sqrt(var + eps) * gamma.reshape(1, d).astype(jnp.float32) \
        + beta.reshape(1, d).astype(jnp.float32)
    y = y.astype(x.dtype)
    if groups:
        return y.reshape(-1, length, groups, d)
    return y.reshape(-1, length, d)


if __name__ == "__main__":
    key = jax.random.PRNGKey(0)

    # ---- 1) small input, groups=2 -> fused single-kernel path (lane-dense) ---
    batch, length, dim = 2, 8, 32
    groups = 2
    d = dim // groups
    kx, kg, kb = jax.random.split(key, 3)
    x = jax.random.normal(kx, (batch, length, dim), dtype=jnp.float32)
    gamma = 1.0 + 0.1 * jax.random.normal(kg, (d,), dtype=jnp.float32)
    beta = 0.05 * jax.random.normal(kb, (d,), dtype=jnp.float32)

    y = jax.block_until_ready(time_first_batchnorm1d(x, gamma, beta, groups=groups))
    y_ref = _reference(x, gamma, beta, groups=groups)
    assert y.shape == (batch, length, groups, d)
    assert jnp.allclose(y, y_ref, atol=1e-4, rtol=1e-4)

    # ---- 2) groups=None fused path -------------------------------------------
    gamma_f = 1.0 + 0.1 * jax.random.normal(kg, (dim,), dtype=jnp.float32)
    beta_f = 0.05 * jax.random.normal(kb, (dim,), dtype=jnp.float32)
    y2 = jax.block_until_ready(
        time_first_batchnorm1d(x, gamma_f, beta_f, groups=None))
    y2_ref = _reference(x, gamma_f, beta_f, groups=None)
    assert y2.shape == (batch, length, dim)
    assert jnp.allclose(y2, y2_ref, atol=1e-4, rtol=1e-4)

    # ---- 3) streaming path (2-chunk parallel reduction, multi-step grid) -----
    b3, l3, dim3, g3 = 4, 512, 256, 4
    d3 = dim3 // g3
    k1, k2, k3 = jax.random.split(jax.random.PRNGKey(1), 3)
    x3 = jax.random.normal(k1, (b3, l3, dim3), dtype=jnp.float32)
    gamma3 = 1.0 + 0.1 * jax.random.normal(k2, (d3,), dtype=jnp.float32)
    beta3 = 0.05 * jax.random.normal(k3, (d3,), dtype=jnp.float32)
    y3 = jax.block_until_ready(
        time_first_batchnorm1d(x3, gamma3, beta3, groups=g3,
                               force_tiled=True, tile_n=256))
    y3_ref = _reference(x3, gamma3, beta3, groups=g3)
    assert y3.shape == (b3, l3, g3, d3)
    assert jnp.allclose(y3, y3_ref, atol=1e-4, rtol=1e-4)

    # ---- 4) streaming path with ragged N (in-kernel tail mask, no padding) ---
    b4, l4, dim4, g4 = 3, 14, 128, 2          # N = 42, not a multiple of the tile
    d4 = dim4 // g4
    k4, k5, k6 = jax.random.split(jax.random.PRNGKey(2), 3)
    x4 = jax.random.normal(k4, (b4, l4, dim4), dtype=jnp.float32)
    gamma4 = 1.0 + 0.1 * jax.random.normal(k5, (d4,), dtype=jnp.float32)
    beta4 = 0.05 * jax.random.normal(k6, (d4,), dtype=jnp.float32)
    y4 = jax.block_until_ready(
        time_first_batchnorm1d(x4, gamma4, beta4, groups=g4,
                               force_tiled=True, tile_n=8))
    y4_ref = _reference(x4, gamma4, beta4, groups=g4)
    assert y4.shape == (b4, l4, g4, d4)
    assert jnp.allclose(y4, y4_ref, atol=1e-4, rtol=1e-4)

    # ---- 5) streaming path with dim < 128 (lane-folded layout) ---------------
    b5, l5, dim5, g5 = 2, 32, 32, 2           # fold f = 128 // 32 = 4
    d5 = dim5 // g5
    k7, k8, k9 = jax.random.split(jax.random.PRNGKey(3), 3)
    x5 = jax.random.normal(k7, (b5, l5, dim5), dtype=jnp.float32)
    gamma5 = 1.0 + 0.1 * jax.random.normal(k8, (d5,), dtype=jnp.float32)
    beta5 = 0.05 * jax.random.normal(k9, (d5,), dtype=jnp.float32)
    y5 = jax.block_until_ready(
        time_first_batchnorm1d(x5, gamma5, beta5, groups=g5,
                               force_tiled=True, tile_n=8))
    y5_ref = _reference(x5, gamma5, beta5, groups=g5)
    assert y5.shape == (b5, l5, g5, d5)
    assert jnp.allclose(y5, y5_ref, atol=1e-4, rtol=1e-4)

    # ---- 6) bf16 streaming path (dtype-aware tiles, sublane=16) --------------
    b6, l6, dim6 = 2, 64, 256
    ka, kb2, kc = jax.random.split(jax.random.PRNGKey(4), 3)
    x6 = jax.random.normal(ka, (b6, l6, dim6), dtype=jnp.bfloat16)
    gamma6 = (1.0 + 0.1 * jax.random.normal(kb2, (dim6,))).astype(jnp.float32)
    beta6 = (0.05 * jax.random.normal(kc, (dim6,))).astype(jnp.float32)
    y6 = jax.block_until_ready(
        time_first_batchnorm1d(x6, gamma6, beta6, groups=None, force_tiled=True))
    y6_ref = _reference(x6, gamma6, beta6, groups=None)
    assert y6.shape == (b6, l6, dim6)
    assert jnp.allclose(y6.astype(jnp.float32), y6_ref.astype(jnp.float32),
                        atol=5e-2, rtol=5e-2)

    print("KERNEL_OK")
</pallas_src>

<mosaic_0001>
module attributes {stable_mosaic.version = 11 : i64} {
  func.func @_fused_kernel(%arg0: memref<16x32xf32, #tpu.memory_space<vmem>>, %arg1: memref<1x16xf32, #tpu.memory_space<vmem>>, %arg2: memref<1x16xf32, #tpu.memory_space<vmem>>, %arg3: memref<16x32xf32, #tpu.memory_space<vmem>>) attributes {dimension_semantics = [], scalar_prefetch = 0 : i64, scratch_operands = 0 : i64, tpu.core_type = #tpu.core_type<tc>} {
    %c0 = arith.constant 0 : index
    %c0_0 = arith.constant 0 : index
    %0 = vector.load %arg0[%c0, %c0_0] : memref<16x32xf32, #tpu.memory_space<vmem>>, vector<16x32xf32>
    %cst = arith.constant dense<0.000000e+00> : vector<32xf32>
    %1 = vector.multi_reduction <add>, %0, %cst [0] : vector<16x32xf32> to vector<32xf32>
    %2 = vector.shape_cast %1 : vector<32xf32> to vector<1x32xf32>
    %3 = arith.mulf %0, %0 : vector<16x32xf32>
    %cst_1 = arith.constant dense<0.000000e+00> : vector<32xf32>
    %4 = vector.multi_reduction <add>, %3, %cst_1 [0] : vector<16x32xf32> to vector<32xf32>
    %5 = vector.shape_cast %4 : vector<32xf32> to vector<1x32xf32>
    %6 = vector.extract_strided_slice %2 {offsets = [0, 0], sizes = [1, 16], strides = [1, 1]} : vector<1x32xf32> to vector<1x16xf32>
    %7 = vector.extract_strided_slice %5 {offsets = [0, 0], sizes = [1, 16], strides = [1, 1]} : vector<1x32xf32> to vector<1x16xf32>
    %8 = vector.extract_strided_slice %2 {offsets = [0, 16], sizes = [1, 16], strides = [1, 1]} : vector<1x32xf32> to vector<1x16xf32>
    %9 = arith.addf %6, %8 : vector<1x16xf32>
    %10 = vector.extract_strided_slice %5 {offsets = [0, 16], sizes = [1, 16], strides = [1, 1]} : vector<1x32xf32> to vector<1x16xf32>
    %11 = arith.addf %7, %10 : vector<1x16xf32>
    %cst_2 = arith.constant 3.125000e-02 : f32
    %12 = vector.broadcast %cst_2 : f32 to vector<1x16xf32>
    %13 = arith.mulf %9, %12 : vector<1x16xf32>
    %cst_3 = arith.constant 3.125000e-02 : f32
    %14 = vector.broadcast %cst_3 : f32 to vector<1x16xf32>
    %15 = arith.mulf %11, %14 : vector<1x16xf32>
    %16 = arith.mulf %13, %13 : vector<1x16xf32>
    %17 = arith.subf %15, %16 : vector<1x16xf32>
    %cst_4 = arith.constant 0.000000e+00 : f32
    %18 = vector.broadcast %cst_4 : f32 to vector<1x16xf32>
    %19 = arith.maximumf %17, %18 : vector<1x16xf32>
    %cst_5 = arith.constant 9.99999974E-6 : f32
    %20 = vector.broadcast %cst_5 : f32 to vector<1x16xf32>
    %21 = arith.addf %19, %20 : vector<1x16xf32>
    %22 = math.rsqrt %21 : vector<1x16xf32>
    %c0_6 = arith.constant 0 : index
    %c0_7 = arith.constant 0 : index
    %23 = vector.load %arg1[%c0_6, %c0_7] : memref<1x16xf32, #tpu.memory_space<vmem>>, vector<1x16xf32>
    %24 = arith.mulf %23, %22 : vector<1x16xf32>
    %c0_8 = arith.constant 0 : index
    %c0_9 = arith.constant 0 : index
    %25 = vector.load %arg2[%c0_8, %c0_9] : memref<1x16xf32, #tpu.memory_space<vmem>>, vector<1x16xf32>
    %26 = arith.mulf %13, %24 : vector<1x16xf32>
    %27 = arith.subf %25, %26 : vector<1x16xf32>
    %28 = tpu.concatenate %24, %24 in 1 : vector<1x16xf32>, vector<1x16xf32> -> vector<1x32xf32>
    %29 = tpu.concatenate %27, %27 in 1 : vector<1x16xf32>, vector<1x16xf32> -> vector<1x32xf32>
    %30 = vector.broadcast %28 : vector<1x32xf32> to vector<16x32xf32>
    %31 = arith.mulf %0, %30 : vector<16x32xf32>
    %32 = vector.broadcast %29 : vector<1x32xf32> to vector<16x32xf32>
    %33 = arith.addf %31, %32 : vector<16x32xf32>
    %c0_10 = arith.constant 0 : index
    %c0_11 = arith.constant 0 : index
    %34 = vector.load %arg3[%c0_10, %c0_11] : memref<16x32xf32, #tpu.memory_space<vmem>>, vector<16x32xf32>
    tpu.vector_store %arg3[%c0_10, %c0_11], %33 {strides = array<i32>} : memref<16x32xf32, #tpu.memory_space<vmem>>, vector<16x32xf32>,
    return
  }
}

</mosaic_0001>

<bundles_post_ra>
// kernel: tpu_custom_call.1
= control target key start
LH: loop header
LB: loop body
LE: loop exit
PB: predicated region body
PF: predicated region fallthrough
CT: control target
= control target key end

     0   :  { %8 = vsyncpa [#allocation3], 0  ;;  %s226_s0 = inlined_call_operand.hbm [shape: f32[16,32], index: 0, kind: input, shape index: {}]   ;;  %s227_s1 = inlined_call_operand.vmem [shape: f32[1,16], index: 1, kind: input, shape index: {}]   ;;  %s228_s2 = inlined_call_operand.vmem [shape: f32[1,16], index: 2, kind: input, shape index: {}]   ;;  %s229_s3 = inlined_call_operand.hbm [shape: f32[16,32], index: 3, kind: output, shape index: {}]  }
   0x1   :  { %9 = vsyncpa [#allocation4], 0  ;;  %s176_s12 = smov [#allocation2]  }
   0x2   :  { %s15_s13 = sshll.u32 %s176_s12, 4  ;;  %s16_s13 = int_to_ptr.vmem [resolvable:$true] %s15_s13 }
   0x3   :  { %s140_s14 = scalar_lea.vmem %s16_s13, 256  ;;  %p145_p1 = scmp.lt.s32.totalorder %s16_s13, %s16_s13 }
   0x4   :  { %p141_p0 = scmp.ne.s32.totalorder %s16_s13, %s140_s14  ;;  %p146_p2 = scmp.lt.s32.totalorder %s140_s14, %s140_s14 }
   0x6   :  { %p147_p3 = por %p146_p2, %p145_p1 }
   0x8   :  { %p148_p4 = pnand %p147_p3, %p141_p0 }
   0xa   :  { %151 = shalt.err (!%p148_p4)
}
   0xb   :  { %s177_s15 = smov 128   ;;  %s178_s16 = smov 8  }
   0xc   :  { %21 = dma.hbm_to_vmem [thread:$0]  %s226_s0, 256, %s16_s13, [#allocation3], %s177_s15, %s177_s15, %s178_s16  }
   0xd   :  { %172 = dma.done.wait [#allocation3], 256  }
   0xe   :  { %173 = vsyncadd [#allocation3], 4294967040  ;;  %vm31_vm0 = vcmask 261120   ;;  %v29_v0 = vld [vmem:[#allocation2] sm:$0xff]  ;;  %v30_v1 = vld [vmem:[#allocation2 + $0x8] sm:$0xff]  ;;  %s179_s0 = smov 112   ;;  %v75_v32 = vlaneseq }
   0xf   :  { %v32_v2 = vsel %vm31_vm0, %v29_v0, 0.0  ;;  %v33_v3 = vsel %vm31_vm0, %v30_v1, 0.0  ;;  %v41_v4 = vmul.f32 %v29_v0, %v29_v0  ;;  %v42_v5 = vmul.f32 %v30_v1, %v30_v1  ;;  %v69_v34 = vld [vmem:[%s227_s1] sm:$0x1]  ;;  %s180_s23 = smov 16   ;;  %s181_s1 = smov [#allocation5]  }
  0x10   :  { %v34_v6 = vadd.f32 %v33_v3, %v32_v2  ;;  %v76_v33 = vshrl.u32 %v75_v32, 7  ;;  %v71_v38 = vld [vmem:[%s228_s2] sm:$0x1]  ;;  %vm82_vm1 = vcmask 130048   ;;  %s112_s24 = sshll.u32 %s181_s1, 4  ;;  %s113_s24 = int_to_ptr.vmem [resolvable:$true] %s112_s24 }
  0x11   :  { %v43_v7 = vsel %vm31_vm0, %v41_v4, 0.0  ;;  %v44_v8 = vsel %vm31_vm0, %v42_v5, 0.0  ;;  %s152_s2 = scalar_lea.vmem %s113_s24, 256  ;;  %p157_p6 = scmp.lt.s32.totalorder %s113_s24, %s113_s24 }
  0x12   :  { %v35_v9 = vrot.slane %v34_v6, 4  ;;  %v45_v10 = vadd.f32 %v44_v8, %v43_v7  ;;  %v77_v35 = vsub.s32 0, %v76_v33  ;;  %p153_p5 = scmp.ne.s32.totalorder %s113_s24, %s152_s2  ;;  %p158_p7 = scmp.lt.s32.totalorder %s152_s2, %s152_s2 }
  0x14   :  { %v36_v11 = vadd.f32 %v35_v9, %v34_v6  ;;  %v46_v12 = vrot.slane %v45_v10, 4  ;;  %p159_p8 = por %p158_p7, %p157_p6 }
  0x16   :  { %v37_v13 = vrot.slane %v36_v11, 2  ;;  %v47_v14 = vadd.f32 %v46_v12, %v45_v10  ;;  %p160_p9 = pnand %p159_p8, %p153_p5 }
  0x18   :  { %v38_v15 = vadd.f32 %v37_v13, %v36_v11  ;;  %v48_v16 = vrot.slane %v47_v14, 2 }
  0x1a   :  { %v39_v17 = vrot.slane %v38_v15, 1  ;;  %v49_v18 = vadd.f32 %v48_v16, %v47_v14 }
  0x1c   :  { %v40_v19 = vadd.f32 %v39_v17, %v38_v15  ;;  %v50_v20 = vrot.slane %v49_v18, 1 }
  0x1e   :  { %53 = vrot.lane.b32.xlu0 %v40_v19, %s179_s0  ;;  %v51_v21 = vadd.f32 %v50_v20, %v49_v18 }
  0x22   :  { %58 = vrot.lane.b32.xlu0 %v51_v21, %s179_s0 }
  0x90   :  { %v54_v22 = vpop.permute.xlu0 %53 }
  0x91   :  { %v56_v23 = vadd.f32 %v54_v22, %v40_v19 }
  0x93   :  { %v62_v24 = vmul.f32 0.03125, %v56_v23 }
  0x94   :  { %v59_v25 = vpop.permute.xlu0 %58 }
  0x95   :  { %v61_v26 = vadd.f32 %v59_v25, %v51_v21  ;;  %v64_v27 = vmul.f32 %v62_v24, %v62_v24 }
  0x97   :  { %v63_v28 = vmul.f32 0.03125, %v61_v26 }
  0x99   :  { %v65_v29 = vsub.f32 %v63_v28, %v64_v27 }
  0x9b   :  { %v66_v30 = vmax.f32 %v65_v29, 0.0 }
  0x9d   :  { %v67_v31 = vadd.f32 1e-05, %v66_v30 }
  0x9f   :  { %130 = vrsqrt.f32 %v67_v31 }
  0xac   :  { %v131_v36 = vpop.eup %130 }
  0xad   :  { %v70_v37 = vmul.f32 %v131_v36, %v69_v34 }
  0xaf   :  { %v78_v39 = vrot.slane %v70_v37, %v77_v35  ;;  %v72_v40 = vmul.f32 %v70_v37, %v62_v24 }
  0xb1   :  { %79 = vrot.lane.b32.xlu1 %v78_v39, %s180_s23  ;;  %v73_v41 = vsub.f32 %v71_v38, %v72_v40 }
  0xb3   :  { %v88_v42 = vrot.slane %v73_v41, %v77_v35 }
  0xb5   :  { %89 = vrot.lane.b32.xlu1 %v88_v42, %s180_s23 }
 0x123   :  { %v80_v43 = vpop.permute.xlu1 %79 }
 0x124   :  { %v83_v44 = vsel %vm82_vm1, %v70_v37, %v80_v43 }
 0x125   :  { %v96_v45 = vrot.slane %v83_v44, %v77_v35 }
 0x127   :  { %v90_v46 = vpop.permute.xlu1 %89  ;;  %v97_v48 = vmul.f32 %v96_v45, %v29_v0  ;;  %v98_v49 = vmul.f32 %v96_v45, %v30_v1 }
 0x128   :  { %v92_v47 = vsel %vm82_vm1, %v73_v41, %v90_v46 }
 0x129   :  { %v102_v50 = vrot.slane %v92_v47, %v77_v35 }
 0x12b   :  { %v103_v51 = vadd.f32 %v102_v50, %v97_v48  ;;  %v104_v52 = vadd.f32 %v102_v50, %v98_v49 }
 0x12d   :  { %105 = vst.msk [vmem:[#allocation5] sm:$0xff] %vm31_vm0, %v103_v51  ;;  %106 = vst.msk [vmem:[#allocation5 + $0x8] sm:$0xff] %vm31_vm0, %v104_v52 }
 0x12e   :  { %163 = shalt.err (!%p160_p9)
}
 0x12f   :  { %118 = dma.vmem_to_hbm [thread:$0]  %s113_s24, 256, %s229_s3, [#allocation4], %s177_s15, %s177_s15, %s178_s16  }
 0x130   :  { %174 = dma.done.wait [#allocation4], 256  }
 0x131   :  { %175 = vsyncadd [#allocation4], 4294967040 }
 0x132   :  { %122 = vsyncpa [#allocation3], 1 }
 0x133   :  { %123 = vsyncpa [#allocation4], 1 }

</bundles_post_ra>
